<compile_context>
chip_gen: v7x
topology: tpu7x:2x2x1
jax: 0.10.0
libtpu: 0.0.40
codegen_flags: <defaults>
</compile_context>

<pallas_src>
import functools

import jax
import jax.numpy as jnp
from jax.experimental import pallas as pl
from jax.experimental.pallas import tpu as pltpu


def _round_up(n, m):
    return ((n + m - 1) // m) * m


def _vmem_limit_bytes():
    """Generation-aware VMEM budget: ~3/4 of physical, capped at 112 MiB."""
    cap = 64 * 1024 * 1024  # conservative fallback (v7x-sized)
    try:
        info = pltpu.get_tpu_info()
        cap = int(getattr(info, "vmem_capacity_bytes", cap))
    except Exception:
        pass
    return min((cap * 3) // 4, 112 * 1024 * 1024)


# ----------------------------------------------------------------------------
# Kernel A: fully VMEM-resident (D, D) weight, 1-D row grid.
# ----------------------------------------------------------------------------
def _sublayer_kernel_resident(x_ref, a_ref, b_ref, w_ref, wb_ref, o_ref, *, eps):
    # x_ref: (tm, D) row tile; a/b/wb: (1, D); w_ref: (D, D) bf16 (y = x @ W).
    x = x_ref[...].astype(jnp.float32)
    d = x.shape[-1]

    # LayerNorm (PyTorch-code semantics: unbiased std, eps added to std).
    mean = jnp.mean(x, axis=-1, keepdims=True)
    diff = x - mean
    del x  # do not keep x live across the MXU call; re-read for the residual
    var_unbiased = jnp.sum(diff * diff, axis=-1, keepdims=True) * (1.0 / (d - 1))
    inv = pl.reciprocal(jnp.sqrt(var_unbiased) + eps, approx=True)  # EUP slot
    normed = a_ref[...].astype(jnp.float32) * (diff * inv) + b_ref[...].astype(
        jnp.float32
    )

    # sublayer: Linear(size, size) — bf16 operands, f32 accumulation (MXU).
    sub = jnp.dot(
        normed.astype(w_ref.dtype), w_ref[...], preferred_element_type=jnp.float32
    )
    sub = sub + wb_ref[...].astype(jnp.float32)

    # dropout (eval mode => identity) + residual; re-read x to shorten live range.
    o_ref[...] = (x_ref[...].astype(jnp.float32) + sub).astype(o_ref.dtype)


# ----------------------------------------------------------------------------
# Kernel B: weight N-tiled over output columns (for large D / small VMEM).
# normed is computed once per row tile (j == 0) into a bf16 VMEM scratch.
# ----------------------------------------------------------------------------
def _sublayer_kernel_ntiled(
    x_ref, xcol_ref, a_ref, b_ref, w_ref, wb_ref, o_ref, normed_ref, *, eps
):
    # x_ref:    (tm, D)  full-row tile (fetched once per row step)
    # xcol_ref: (tm, tn) column slice of x (residual)
    # w_ref:    (D, tn)  weight column tile (streamed over j)
    # wb_ref:   (1, tn)  bias column tile
    @pl.when(pl.program_id(1) == 0)
    def _():
        x = x_ref[...].astype(jnp.float32)
        d = x.shape[-1]
        mean = jnp.mean(x, axis=-1, keepdims=True)
        diff = x - mean
        var_unbiased = jnp.sum(diff * diff, axis=-1, keepdims=True) * (1.0 / (d - 1))
        inv = pl.reciprocal(jnp.sqrt(var_unbiased) + eps, approx=True)
        normed_ref[...] = (
            a_ref[...].astype(jnp.float32) * (diff * inv)
            + b_ref[...].astype(jnp.float32)
        ).astype(normed_ref.dtype)

    sub = jnp.dot(normed_ref[...], w_ref[...], preferred_element_type=jnp.float32)
    sub = sub + wb_ref[...].astype(jnp.float32)
    o_ref[...] = (xcol_ref[...].astype(jnp.float32) + sub).astype(o_ref.dtype)


def _pick_row_tile(M, D):
    """~2 MiB of f32 x per grid step, 256-multiple, clamped to [256, 2048]."""
    tm = (2 * 1024 * 1024) // (D * 4)
    tm = max(256, min(2048, (tm // 256) * 256))
    tm = min(tm, _round_up(M, 8))
    # Give v7x's second TensorCore work when the row grid would be a single step.
    if pl.cdiv(M, tm) < 2 and M > 8:
        tm = _round_up(-(-M // 2), 8)
    return tm


def sublayer_connection(
    x,
    ln_gain,
    ln_bias,
    w,
    w_bias,
    *,
    eps=1e-6,
    tm=None,
    tn=None,
    mxu_dtype=jnp.bfloat16,
    out_dtype=None,
):
    """x: (B, T, D). Returns x + Linear(LayerNorm(x)) with PyTorch-code LN semantics.

    Pass `w` already in bf16 (pre-cast at parameter-load time) to avoid a
    per-call HBM round trip for the cast.
    """
    B, T, D = x.shape
    M = B * T
    out_dtype = x.dtype if out_dtype is None else out_dtype

    # Hoisted cast: only cast here if the caller did not pre-convert.
    w_mxu = w if w.dtype == mxu_dtype else w.astype(mxu_dtype)

    vmem_limit = _vmem_limit_bytes()

    tm_eff = _pick_row_tile(M, D) if tm is None else min(tm, _round_up(M, 8))
    grid_m = pl.cdiv(M, tm_eff)

    x2 = x.reshape(M, D)

    # Decide whether the (D, D) weight can stay fully VMEM-resident.
    weight_bytes = D * D * jnp.dtype(mxu_dtype).itemsize
    use_ntile = tn is not None or weight_bytes > vmem_limit // 3
    if use_ntile and tn is None:
        for cand in (1024, 512, 256, 128):
            if D % cand == 0:
                tn = cand
                break
        else:  # D not a multiple of 128: fall back to the resident path
            use_ntile = False

    if not use_ntile:
        kernel = functools.partial(_sublayer_kernel_resident, eps=float(eps))
        const_spec = lambda shape: pl.BlockSpec(  # noqa: E731
            shape, lambda i: (0, 0), pipeline_mode=pl.Buffered(1)
        )
        out2 = pl.pallas_call(
            kernel,
            out_shape=jax.ShapeDtypeStruct((M, D), out_dtype),
            grid_spec=pltpu.PrefetchScalarGridSpec(
                num_scalar_prefetch=0,
                grid=(grid_m,),
                in_specs=[
                    pl.BlockSpec((tm_eff, D), lambda i: (i, 0)),  # x rows (streamed)
                    const_spec((1, D)),                            # LN gain a_2
                    const_spec((1, D)),                            # LN bias b_2
                    const_spec((D, D)),                            # weight (bf16, resident)
                    const_spec((1, D)),                            # linear bias
                ],
                out_specs=pl.BlockSpec((tm_eff, D), lambda i: (i, 0)),
            ),
            compiler_params=pltpu.CompilerParams(
                dimension_semantics=("parallel",),
                vmem_limit_bytes=vmem_limit,
            ),
        )(x2, ln_gain, ln_bias, w_mxu, w_bias)
    else:
        grid_n = D // tn
        kernel = functools.partial(_sublayer_kernel_ntiled, eps=float(eps))
        const_spec = lambda shape: pl.BlockSpec(  # noqa: E731
            shape, lambda i, j: (0, 0), pipeline_mode=pl.Buffered(1)
        )
        out2 = pl.pallas_call(
            kernel,
            out_shape=jax.ShapeDtypeStruct((M, D), out_dtype),
            grid_spec=pltpu.PrefetchScalarGridSpec(
                num_scalar_prefetch=0,
                grid=(grid_m, grid_n),
                in_specs=[
                    pl.BlockSpec((tm_eff, D), lambda i, j: (i, 0)),   # x full rows (LN)
                    pl.BlockSpec((tm_eff, tn), lambda i, j: (i, j)),  # x column slice
                    const_spec((1, D)),                                # LN gain a_2
                    const_spec((1, D)),                                # LN bias b_2
                    pl.BlockSpec((D, tn), lambda i, j: (0, j)),        # weight col tile
                    pl.BlockSpec((1, tn), lambda i, j: (0, j)),        # bias col tile
                ],
                out_specs=pl.BlockSpec((tm_eff, tn), lambda i, j: (i, j)),
                scratch_shapes=[pltpu.VMEM((tm_eff, D), mxu_dtype)],   # normed(x)
            ),
            compiler_params=pltpu.CompilerParams(
                dimension_semantics=("parallel", "arbitrary"),
                vmem_limit_bytes=vmem_limit,
            ),
        )(x2, x2, ln_gain, ln_bias, w_mxu, w_bias)

    return out2.reshape(B, T, D)


def _reference(x, ln_gain, ln_bias, w, w_bias, eps=1e-6):
    """Pure-JAX f32 reference with the module's exact semantics."""
    xf = x.astype(jnp.float32)
    mean = jnp.mean(xf, axis=-1, keepdims=True)
    diff = xf - mean
    var = jnp.sum(diff * diff, axis=-1, keepdims=True) / (x.shape[-1] - 1)
    std = jnp.sqrt(var)
    normed = ln_gain * diff / (std + eps) + ln_bias
    sub = normed @ w + w_bias
    return xf + sub


if __name__ == "__main__":
    key = jax.random.PRNGKey(0)
    keys = jax.random.split(key, 8)

    # bf16 matmul operands + approx EUP reciprocal => loose tolerances.
    atol = rtol = 6e-2

    def make_params(D, kw, kb):
        ln_gain = jnp.ones((1, D), dtype=jnp.float32)
        ln_bias = jnp.zeros((1, D), dtype=jnp.float32)
        w = jax.random.normal(kw, (D, D), dtype=jnp.float32) * (1.0 / jnp.sqrt(D))
        w_bias = jax.random.normal(kb, (1, D), dtype=jnp.float32) * 0.01
        # Hoisted MXU cast: convert the weight once at "parameter load" time.
        w_bf16 = w.astype(jnp.bfloat16)
        return ln_gain, ln_bias, w, w_bias, w_bf16

    # Case 1: small, tile-divisible rows (resident-weight path, D=128).
    D = 128
    ln_gain, ln_bias, w, w_bias, w_bf16 = make_params(D, keys[0], keys[1])
    B, T = 2, 8
    x = jax.random.normal(keys[2], (B, T, D), dtype=jnp.float32)
    out = jax.block_until_ready(
        sublayer_connection(x, ln_gain, ln_bias, w_bf16, w_bias)
    )
    ref = _reference(x, ln_gain, ln_bias, w, w_bias)
    assert out.shape == (B, T, D)
    assert jnp.allclose(out, ref, atol=atol, rtol=rtol), "mismatch (case 1)"

    # Case 2: ragged row count -> masked partial tail block (no pad / no slice).
    B2, T2 = 2, 13
    x2 = jax.random.normal(keys[3], (B2, T2, D), dtype=jnp.float32)
    out2 = jax.block_until_ready(
        sublayer_connection(x2, ln_gain, ln_bias, w_bf16, w_bias)
    )
    ref2 = _reference(x2, ln_gain, ln_bias, w, w_bias)
    assert out2.shape == (B2, T2, D)
    assert jnp.allclose(out2, ref2, atol=atol, rtol=rtol), "mismatch (case 2)"

    # Case 3: force the weight-N-tiled path (tn=128 at D=256) — the path that
    # keeps large-D weights from overflowing v7x's 64 MiB VMEM.
    D3 = 256
    ln_gain3, ln_bias3, w3, w_bias3, w3_bf16 = make_params(D3, keys[4], keys[5])
    x3 = jax.random.normal(keys[6], (2, 8, D3), dtype=jnp.float32)
    out3 = jax.block_until_ready(
        sublayer_connection(x3, ln_gain3, ln_bias3, w3_bf16, w_bias3, tn=128)
    )
    ref3 = _reference(x3, ln_gain3, ln_bias3, w3, w_bias3)
    assert out3.shape == (2, 8, D3)
    assert jnp.allclose(out3, ref3, atol=atol, rtol=rtol), "mismatch (case 3)"

    print("KERNEL_OK")
</pallas_src>

<mosaic_0001>
module attributes {stable_mosaic.version = 11 : i64} {
  func.func @_sublayer_kernel_resident(%arg0: i32, %arg1: memref<8x128xf32, #tpu.memory_space<vmem>>, %arg2: memref<1x128xf32, #tpu.memory_space<vmem>>, %arg3: memref<1x128xf32, #tpu.memory_space<vmem>>, %arg4: memref<128x128xbf16, #tpu.memory_space<vmem>>, %arg5: memref<1x128xf32, #tpu.memory_space<vmem>>, %arg6: memref<8x128xf32, #tpu.memory_space<vmem>>) attributes {dimension_semantics = [#tpu.dimension_semantics<parallel>], iteration_bounds = array<i64: 2>, scalar_prefetch = 0 : i64, scratch_operands = 0 : i64, tpu.core_type = #tpu.core_type<tc>, window_params = [{transform_indices = @transform_0, window_bounds = array<i64: 8, 128>}, {pipeline_mode = #tpu.pipeline_mode<synchronous>, transform_indices = @transform_1, window_bounds = array<i64: 1, 128>}, {pipeline_mode = #tpu.pipeline_mode<synchronous>, transform_indices = @transform_2, window_bounds = array<i64: 1, 128>}, {pipeline_mode = #tpu.pipeline_mode<synchronous>, transform_indices = @transform_3, window_bounds = array<i64: 128, 128>}, {pipeline_mode = #tpu.pipeline_mode<synchronous>, transform_indices = @transform_4, window_bounds = array<i64: 1, 128>}, {transform_indices = @transform_5, window_bounds = array<i64: 8, 128>}]} {
    %c0 = arith.constant 0 : index
    %c0_0 = arith.constant 0 : index
    %0 = vector.load %arg1[%c0, %c0_0] : memref<8x128xf32, #tpu.memory_space<vmem>>, vector<8x128xf32>
    %cst = arith.constant dense<0.000000e+00> : vector<8xf32>
    %1 = vector.multi_reduction <add>, %0, %cst [1] : vector<8x128xf32> to vector<8xf32>
    %2 = vector.shape_cast %1 : vector<8xf32> to vector<8x1xf32>
    %cst_1 = arith.constant 1.280000e+02 : f32
    %3 = vector.broadcast %cst_1 : f32 to vector<8x1xf32>
    %4 = arith.divf %2, %3 : vector<8x1xf32>
    %5 = vector.broadcast %4 : vector<8x1xf32> to vector<8x128xf32>
    %6 = arith.subf %0, %5 : vector<8x128xf32>
    %7 = arith.mulf %6, %6 : vector<8x128xf32>
    %cst_2 = arith.constant dense<0.000000e+00> : vector<8xf32>
    %8 = vector.multi_reduction <add>, %7, %cst_2 [1] : vector<8x128xf32> to vector<8xf32>
    %9 = vector.shape_cast %8 : vector<8xf32> to vector<8x1xf32>
    %cst_3 = arith.constant 0.00787401571 : f32
    %10 = vector.broadcast %cst_3 : f32 to vector<8x1xf32>
    %11 = arith.mulf %9, %10 : vector<8x1xf32>
    %12 = math.sqrt %11 : vector<8x1xf32>
    %cst_4 = arith.constant 9.99999997E-7 : f32
    %13 = vector.broadcast %cst_4 : f32 to vector<8x1xf32>
    %14 = arith.addf %12, %13 : vector<8x1xf32>
    %15 = tpu.reciprocal %14 {approx = true} : vector<8x1xf32> -> vector<8x1xf32>
    %c0_5 = arith.constant 0 : index
    %c0_6 = arith.constant 0 : index
    %16 = vector.load %arg2[%c0_5, %c0_6] : memref<1x128xf32, #tpu.memory_space<vmem>>, vector<1x128xf32>
    %17 = vector.broadcast %15 : vector<8x1xf32> to vector<8x128xf32>
    %18 = arith.mulf %6, %17 : vector<8x128xf32>
    %19 = vector.broadcast %16 : vector<1x128xf32> to vector<8x128xf32>
    %20 = arith.mulf %19, %18 : vector<8x128xf32>
    %c0_7 = arith.constant 0 : index
    %c0_8 = arith.constant 0 : index
    %21 = vector.load %arg3[%c0_7, %c0_8] : memref<1x128xf32, #tpu.memory_space<vmem>>, vector<1x128xf32>
    %22 = vector.broadcast %21 : vector<1x128xf32> to vector<8x128xf32>
    %23 = arith.addf %20, %22 : vector<8x128xf32>
    %24 = arith.truncf %23 : vector<8x128xf32> to vector<8x128xbf16>
    %c0_9 = arith.constant 0 : index
    %c0_10 = arith.constant 0 : index
    %25 = vector.load %arg4[%c0_9, %c0_10] : memref<128x128xbf16, #tpu.memory_space<vmem>>, vector<128x128xbf16>
    %cst_11 = arith.constant dense<0.000000e+00> : vector<8x128xf32>
    %26 = tpu.matmul %24, %25, %cst_11 {dimension_numbers = #tpu.dot_dimension_numbers<[1], [0], [0], [1], [0, 0, 1, 1], [], []>} : vector<8x128xbf16>, vector<128x128xbf16>, vector<8x128xf32> -> vector<8x128xf32>
    %c0_12 = arith.constant 0 : index
    %c0_13 = arith.constant 0 : index
    %27 = vector.load %arg5[%c0_12, %c0_13] : memref<1x128xf32, #tpu.memory_space<vmem>>, vector<1x128xf32>
    %28 = vector.broadcast %27 : vector<1x128xf32> to vector<8x128xf32>
    %29 = arith.addf %26, %28 : vector<8x128xf32>
    %c0_14 = arith.constant 0 : index
    %c0_15 = arith.constant 0 : index
    %30 = vector.load %arg1[%c0_14, %c0_15] : memref<8x128xf32, #tpu.memory_space<vmem>>, vector<8x128xf32>
    %31 = arith.addf %30, %29 : vector<8x128xf32>
    %c0_16 = arith.constant 0 : index
    %c0_17 = arith.constant 0 : index
    %32 = vector.load %arg6[%c0_16, %c0_17] : memref<8x128xf32, #tpu.memory_space<vmem>>, vector<8x128xf32>
    tpu.vector_store %arg6[%c0_16, %c0_17], %31 {strides = array<i32>} : memref<8x128xf32, #tpu.memory_space<vmem>>, vector<8x128xf32>,
    return
  }
  func.func @transform_0(%arg0: i32) -> (i32, i32) {
    %c0_i32 = arith.constant 0 : i32
    %c0_i32_0 = arith.constant 0 : i32
    return %arg0, %c0_i32 : i32, i32
  }
  func.func @transform_1(%arg0: i32) -> (i32, i32) {
    %c0_i32 = arith.constant 0 : i32
    %c0_i32_0 = arith.constant 0 : i32
    %c0_i32_1 = arith.constant 0 : i32
    return %c0_i32, %c0_i32_0 : i32, i32
  }
  func.func @transform_2(%arg0: i32) -> (i32, i32) {
    %c0_i32 = arith.constant 0 : i32
    %c0_i32_0 = arith.constant 0 : i32
    %c0_i32_1 = arith.constant 0 : i32
    return %c0_i32, %c0_i32_0 : i32, i32
  }
  func.func @transform_3(%arg0: i32) -> (i32, i32) {
    %c0_i32 = arith.constant 0 : i32
    %c0_i32_0 = arith.constant 0 : i32
    %c0_i32_1 = arith.constant 0 : i32
    return %c0_i32, %c0_i32_0 : i32, i32
  }
  func.func @transform_4(%arg0: i32) -> (i32, i32) {
    %c0_i32 = arith.constant 0 : i32
    %c0_i32_0 = arith.constant 0 : i32
    %c0_i32_1 = arith.constant 0 : i32
    return %c0_i32, %c0_i32_0 : i32, i32
  }
  func.func @transform_5(%arg0: i32) -> (i32, i32) {
    %c0_i32 = arith.constant 0 : i32
    %c0_i32_0 = arith.constant 0 : i32
    return %arg0, %c0_i32 : i32, i32
  }
}

</mosaic_0001>

<bundles_post_ra>
// kernel: tpu_custom_call.1
= control target key start
LH: loop header
LB: loop body
LE: loop exit
PB: predicated region body
PF: predicated region fallthrough
CT: control target
= control target key end

     0   :  { %10 = vsyncpa [#allocation3], 0  ;;  %s1003_s0 = inlined_call_operand.hbm [shape: f32[16,128], index: 0, kind: input, shape index: {}]   ;;  %s1004_s1 = inlined_call_operand.vmem [shape: f32[1,128], index: 1, kind: input, shape index: {}]   ;;  %s1005_s2 = inlined_call_operand.vmem [shape: f32[1,128], index: 2, kind: input, shape index: {}]   ;;  %s1006_s3 = inlined_call_operand.hbm [shape: bf16[128,128], index: 3, kind: input, shape index: {}]   ;;  %s1007_s4 = inlined_call_operand.vmem [shape: f32[1,128], index: 4, kind: input, shape index: {}]   ;;  %s1008_s5 = inlined_call_operand.hbm [shape: f32[16,128], index: 5, kind: output, shape index: {}]  }
   0x1   :  { %12 = vsyncpa [#allocation3 + $0x1], 0 }
   0x2   :  { %13 = vsyncpa [#allocation6], 0 }
   0x3   :  { %14 = vsyncpa [#allocation4], 0 }
   0x4   :  { %16 = vsyncpa [#allocation4 + $0x1], 0  ;;  %s794_s18 = smov 0   ;;  %s796_s19 = smov 0  }
   0x5   :  { %s798_s20 = smov 0   ;;  %s800_s21 = smov 0  }
   0x6 LB: > { %s815_s22 = sadd.s32 4294967295, %s755_s21   ;;  %s500_s23 = sadd.s32 4294967294, %s755_s21   ;;  %s755_s21 = sphi %s800_s21, %s1028_s21   ;;  %s751_s20 = sphi %s798_s20, %s1027_s20   ;;  %s747_s19 = sphi %s796_s19, %s1026_s19   ;;  %s743_s18 = sphi %s794_s18, %s1025_s18  }
   0x7   : > { %p42_p0 = scmp.ne.s32.totalorder %s747_s19, %s743_s18  ;;  %p1009_p1 = scmp.eq.s32.totalorder %s815_s22, 0 }
   0x8   : > { %p156_p3 = scmp.eq.s32.totalorder %s500_s23, 1  ;;  %p501_p5 = scmp.ge.s32.totalorder %s755_s21, 1 }
   0x9   : > { %p824_p4 = por %p1009_p1, %p42_p0  ;;  %p163_p7 = scmp.lt.s32.totalorder %s755_s21, 3 }
   0xa   : > { %p829_p6 = por %p156_p3, %p42_p0  ;;  %s757_s27 = smov [#allocation5]  }
   0xb   : > { %s1012_s24 = scalar_select %p824_p4, 1, 0 }
   0xc   : > { %s1013_s25 = scalar_select %p829_p6, 1, 0 }
   0xd   : > { %p834_p8 = pnand %p501_p5, %p163_p7  ;;  %s181_s28 = sshll.u32 %s757_s27, 4  ;;  %s838_s28 = int_to_ptr.vmem [resolvable:$true] %s181_s28 }
   0xe   : > { %s850_s30 = sadd.s32 1, %s755_s21   ;;  %s29_s6 = sadd.s32 1, %s751_s20 }
   0xf   : > { %s1014_s26 = scalar_select %p834_p8, 1, 0 }
  0x10   : > { %p562_p9 = pneg %p834_p8  ;;  %s26_s7 = ssub.s32 %s755_s21, %s850_s30 }
  0x11   : > { %s627_s10 = scalar_lea.hbm %s1006_s3, 1024 }
  0x12   : > { %p845_p11 = pnand %p562_p9, %p1009_p1  ;;  %p628_p12 = scmp.ne.s32.totalorder %s1006_s3, %s627_s10 }
  0x13   : > { %p634_p5 = scmp.lt.u32.totalorder %s627_s10, %s1006_s3 }
  0x14   : > { %p629_p13 = pneg %p845_p11 }
  0x16   : > { %p630_p0 = pnand %p629_p13, %p628_p12 }
  0x18   : > { %p631_p3 = pneg %p630_p0 }
  0x1a   : > { %p636_p7 = pnand %p634_p5, %p631_p3 }
  0x1c   : > { %639 = shalt.err (!%p636_p7)
}
  0x1d   : > { %s640_s15 = scalar_lea.vmem %s838_s28, 1024  ;;  %p648_p2 = scmp.lt.s32.totalorder %s838_s28, %s838_s28 }
  0x1e   : > { %p641_p9 = scmp.ne.s32.totalorder %s838_s28, %s640_s15  ;;  %p649_p6 = scmp.lt.s32.totalorder %s640_s15, %s640_s15 }
  0x20   : > { %p643_p10 = pnand %p641_p9, %p629_p13  ;;  %p650_p4 = por %p649_p6, %p648_p2 }
  0x22   : > { %p644_p1 = pneg %p643_p10 }
  0x24   : > { %p651_p8 = pnand %p650_p4, %p644_p1 }
  0x26   : > { %654 = shalt.err (!%p651_p8)
}
  0x27   : > { %s758_s16 = smov 64   ;;  %s759_s17 = smov 4  }
  0x28   : > { %565 = dma.hbm_to_vmem [thread:$0]  (!%p845_p11), %s1006_s3, 1024, %s838_s28, [#allocation6], %s758_s16, %s758_s16, %s759_s17  }
  0x29   : > { %p27_p2 = scmp.eq.s32.totalorder %s26_s7, 0  ;;  %p36_p1 = scmp.ne.s32.totalorder %s751_s20, %s747_s19 }
  0x2a   : > { %p37_p4 = scmp.eq.s32.totalorder %s755_s21, 0  ;;  %p575_p6 = scmp.lt.s32.totalorder %s755_s21, 2 }
  0x2b   : > { %s881_s8 = scalar_select %p27_p2, %s751_s20, %s29_s6  }
  0x2c   : > { %p38_p8 = por %p37_p4, %p36_p1  ;;  %p1016_p10 = scmp.eq.s32.totalorder %s815_s22, 1 }
  0x2d   : > { %s198_s10 = sand.u32 1, %s751_s20   ;;  %s505_s11 = sshll.u32 %s755_s21, 7 }
  0x2e   : > { %p885_p12 = por %p1016_p10, %p36_p1  ;;  %s504_s12 = sshll.u32 %s198_s10, 3 }
  0x2f   : > { %s894_s14 = scalar_lea.hbm %s1003_s0, %s505_s11  ;;  %s202_s28 = scalar_lea.vmem [#allocation2], %s504_s12 }
  0x30   : > { %s209_s6 = sshll.u32 %s202_s28, 4  ;;  %p896_p11 = pnand %p575_p6, %p38_p8  ;;  %s900_s6 = int_to_ptr.vmem [resolvable:$true] %s209_s6 }
  0x31   : > { %s199_s15 = scalar_lea.sflag [#allocation3], %s198_s10  ;;  %s655_s16 = scalar_lea.hbm %s894_s14, 128 }
  0x32   : > { %p656_p13 = scmp.ne.s32.totalorder %s894_s14, %s655_s16  ;;  %p657_p0 = pneg %p896_p11 }
  0x33   : > { %s660_s27 = scalar_lea.hbm %s1003_s0, 256  ;;  %p661_p7 = scmp.lt.u32.totalorder %s894_s14, %s1003_s0 }
  0x34   : > { %p658_p3 = pnand %p657_p0, %p656_p13  ;;  %p662_p9 = scmp.lt.u32.totalorder %s660_s27, %s655_s16 }
  0x35   : > { %p664_p1 = scmp.lt.u32.totalorder %s655_s16, %s894_s14 }
  0x36   : > { %p659_p5 = pneg %p658_p3  ;;  %p663_p2 = por %p662_p9, %p661_p7 }
  0x38   : > { %p665_p4 = por %p664_p1, %p663_p2 }
  0x3a   : > { %p666_p6 = pnand %p665_p4, %p659_p5 }
  0x3c   : > { %669 = shalt.err (!%p666_p6)
}
  0x3d   : > { %s670_s10 = scalar_lea.vmem %s900_s6, 128  ;;  %s760_s29 = smov [#allocation2]  }
  0x3e   : > { %p671_p8 = scmp.ne.s32.totalorder %s900_s6, %s670_s10  ;;  %s675_s13 = sshll.u32 %s760_s29, 4  ;;  %s676_s13 = int_to_ptr.vmem [resolvable:$false] %s675_s13 }
  0x3f   : > { %s677_s28 = scalar_lea.vmem %s676_s13, 256  ;;  %p678_p3 = scmp.lt.s32.totalorder %s900_s6, %s676_s13 }
  0x40   : > { %p673_p10 = pnand %p671_p8, %p657_p0  ;;  %p679_p7 = scmp.lt.s32.totalorder %s677_s28, %s670_s10 }
  0x42   : > { %p674_p13 = pneg %p673_p10  ;;  %p680_p9 = por %p679_p7, %p678_p3 }
  0x44   : > { %p681_p2 = pnand %p680_p9, %p674_p13 }
  0x46   : > { %684 = shalt.err (!%p681_p2)
}
  0x47   : > { %569 = dma.hbm_to_vmem [thread:$0]  (!%p896_p11), %s894_s14, 128, %s900_s6, %s199_s15  }
  0x48   : > { %p1019_p5 = scmp.ne.s32.totalorder %s1014_s26, 0 }
  0x49   : > { %s930_s16 = sand.u32 (!%p1019_p5), 1, %s747_s19   ;;  %p1020_p0 = scmp.ne.s32.totalorder (!%p1019_p5), %s1012_s24, 0 }
  0x4a   : > { %218 = sbr.rel (%p1019_p5) target bundleno = 644 (0x284), region = 40  ;;  %s507_s17 = sshll.u32 (!%p1019_p5), %s930_s16, 3 }
  0x4b   : > { %s221_s23 = scalar_lea.sflag (!%p1019_p5), [#allocation3], %s930_s16  ;;  %s224_s27 = scalar_lea.vmem (!%p1019_p5), [#allocation2], %s507_s17 }
  0x51   : > { %730 = dma.done.wait (%p1020_p0), %s221_s23, 128  }
  0x52   : > { %732 = vsyncadd (%p1020_p0), %s221_s23, 4294967168  ;;  %p1021_p11 = scmp.eq.s32.totalorder %s815_s22, 0 }
  0x54   : > { %734 = dma.done.wait (%p1021_p11), [#allocation6], 1024   ;;  %p1022_p1 = pmov %p1021_p11 }
  0x55   : > { %v256_v0 = vld [vmem:[%s224_s27] sm:$0xff]  ;;  %v615_v5 = vld [vmem:[#allocation5] sm:$0xff]   ;;  %v761_v6 = vmov 0.0   ;;  %v616_v7 = vld [vmem:[#allocation5 + $0x8] sm:$0xff]   ;;  %vm762_vm0 = vmmov 0   ;;  %s522_s11 = sshll.u32 %s815_s22, 7 }
  0x56   : > { %736 = vsyncadd (%p1022_p1), [#allocation6], 4294966272  ;;  %257 = vadd.xlane.f32.xlu0 %v256_v0  ;;  %534 = vmatprep.subr.bf16.mxu0 %v761_v6  ;;  %v617_v8 = vld [vmem:[#allocation5 + $0x10] sm:$0xff]   ;;  %v618_v9 = vld [vmem:[#allocation5 + $0x18] sm:$0xff]   ;;  %s254_s12 = scalar_lea.vmem [#allocation7], %s507_s17  ;;  %s959_s28 = scalar_lea.hbm %s1008_s5, %s522_s11 }
  0x57   : > { %535 = vmatpush3.bf16.msra.mxu0 %v615_v5  ;;  %550 = vmatprep.mubr.msk.bf16.mxu0 %vm762_vm0, %v761_v6  ;;  %v619_v10 = vld [vmem:[#allocation5 + $0x20] sm:$0xff]   ;;  %v620_v11 = vld [vmem:[#allocation5 + $0x28] sm:$0xff]   ;;  %v621_v12 = vld [vmem:[#allocation5 + $0x30] sm:$0xff]   ;;  %s420_s10 = sshll.u32 %s254_s12, 4  ;;  %s407_s22 = scalar_lea.sflag [#allocation4], %s930_s16  ;;  %s961_s10 = int_to_ptr.vmem [resolvable:$true] %s420_s10 }
  0x58   : > { %536 = vmatprep.subr.bf16.mxu0 %v761_v6  ;;  %v622_v13 = vld [vmem:[#allocation5 + $0x38] sm:$0xff]   ;;  %v510_v23 = vld [vmem:[%s1004_s1] ss:$0 sm:$0xff]  ;;  %s685_s23 = scalar_lea.vmem %s961_s10, 128  ;;  %s763_s17 = smov [#allocation7]  }
  0x59   : > { %v511_v25 = vld [vmem:[%s1005_s2] ss:$0 sm:$0xff]  ;;  %p686_p4 = scmp.ne.s32.totalorder %s961_s10, %s685_s23  ;;  %s689_s27 = sshll.u32 %s763_s17, 4  ;;  %s690_s27 = int_to_ptr.vmem [resolvable:$false] %s689_s27 }
  0x5a   : > { %v512_v29 = vld [vmem:[%s1007_s4] ss:$0 sm:$0xff]  ;;  %s691_s24 = scalar_lea.vmem %s690_s27, 256  ;;  %p692_p10 = scmp.lt.s32.totalorder %s961_s10, %s690_s27 }
  0x5b   : > { %537 = vmatpush3.bf16.msra.mxu0 %v616_v7  ;;  %p687_p6 = pnand %p686_p4, %p885_p12  ;;  %p693_p13 = scmp.lt.s32.totalorder %s691_s24, %s685_s23 }
  0x5c   : > { %538 = vmatprep.subr.bf16.mxu0 %v761_v6 }
  0x5d   : > { %p688_p8 = pneg %p687_p6  ;;  %p694_p3 = por %p693_p13, %p692_p10 }
  0x5f   : > { %539 = vmatpush3.bf16.msra.mxu0 %v617_v8  ;;  %p695_p7 = pnand %p694_p3, %p688_p8 }
  0x60   : > { %540 = vmatprep.subr.bf16.mxu0 %v761_v6 }
  0x63   : > { %541 = vmatpush3.bf16.msra.mxu0 %v618_v9 }
  0x64   : > { %542 = vmatprep.subr.bf16.mxu0 %v761_v6 }
  0x67   : > { %543 = vmatpush3.bf16.msra.mxu0 %v619_v10 }
  0x68   : > { %544 = vmatprep.subr.bf16.mxu0 %v761_v6 }
  0x6b   : > { %545 = vmatpush3.bf16.msra.mxu0 %v620_v11 }
  0x6c   : > { %546 = vmatprep.subr.bf16.mxu0 %v761_v6 }
  0x6f   : > { %547 = vmatpush3.bf16.msra.mxu0 %v621_v12 }
  0x70   : > { %548 = vmatprep.subr.bf16.mxu0 %v761_v6 }
  0x73   : > { %549 = vmatpush3.bf16.msra.mxu0 %v622_v13 }
  0xe3   : > { %v258_v1 = vpop.xlane.xlu0 %257 }
  0xe4   : > { %v260_v2 = vmul.f32 0.0078125, %v258_v1 }
  0xe6   : > { %v261_v3 = vsub.f32 %v256_v0, %v260_v2 }
  0xe8   : > { %v262_v4 = vmul.f32 %v261_v3, %v261_v3 }
  0xea   : > { %263 = vadd.xlane.f32.xlu0 %v262_v4 }
 0x177   : > { %v264_v14 = vpop.xlane.xlu0 %263 }
 0x178   : > { %v265_v15 = vmul.f32 0.007874016, %v264_v14 }
 0x17a   : > { %623 = vrsqrt.f32 %v265_v15  ;;  %vm268_vm1 = vcmp.eq.f32.partialorder %v265_v15, inf  ;;  %v271_v18 = vand.u32 2147483648, %v265_v15  ;;  %vm270_vm2 = vcmp.eq.f32.partialorder %v265_v15, 0.0 }
 0x184   : > { %v624_v16 = vpop.eup %623 }
 0x185   : > { %v267_v17 = vmul.f32 %v624_v16, %v265_v15 }
 0x187   : > { %v269_v19 = vsel %vm268_vm1, %v265_v15, %v267_v17 }
 0x188   : > { %v272_v20 = vsel %vm270_vm2, %v271_v18, %v269_v19 }
 0x189   : > { %v273_v21 = vadd.f32 1e-06, %v272_v20 }
 0x18b   : > { %625 = vrcp.f32 %v273_v21 }
 0x195   : > { %v626_v22 = vpop.eup %625 }
 0x196   : > { %v276_v24 = vmul.f32 %v626_v22, %v261_v3 }
 0x198   : > { %v283_v26 = vmul.f32 %v510_v23, %v276_v24 }
 0x19a   : > { %v291_v27 = vadd.f32 %v511_v25, %v283_v26 }
 0x19c   : > { %v292_v28 = vpack.c.bf16 %v291_v27, %v291_v27 }
 0x19e   : > { %551 = vmatmul.mubr.bf16.vlgmr.msra.gmra.mrb[0].mxu0 %v292_v28 }
 0x271   : > { %v398_v30 = vpop.f32.mrb[0].mxu0 }
 0x272   : > { %v399_v31 = vadd.f32 %v512_v29, %v398_v30  ;;  %v552_v32 = vpop.f32.mrb[1].mxu0 }
 0x273   : > { %v401_v33 = vpop.f32.mrb[2].mxu0 }
 0x274   : > { %v404_v34 = vadd.f32 %v399_v31, %v256_v0  ;;  %v553_v35 = vpop.f32.mrb[3].mxu0 }
 0x276   : > { %405 = vst [vmem:[%s254_s12] sm:$0xff] %v404_v34 }
 0x277   : > { %698 = shalt.err (!%p695_p7)
}
 0x278   : > { %s699_s16 = scalar_lea.hbm %s959_s28, 128  ;;  %s703_s6 = scalar_lea.hbm %s1008_s5, 256 }
 0x279   : > { %p700_p9 = scmp.ne.s32.totalorder %s959_s28, %s699_s16  ;;  %p704_p0 = scmp.lt.u32.totalorder %s959_s28, %s1008_s5 }
 0x27a   : > { %p705_p11 = scmp.lt.u32.totalorder %s703_s6, %s699_s16  ;;  %p707_p4 = scmp.lt.u32.totalorder %s699_s16, %s959_s28 }
 0x27b   : > { %p701_p2 = pnand %p700_p9, %p885_p12 }
 0x27c   : > { %p706_p1 = por %p705_p11, %p704_p0 }
 0x27d   : > { %p702_p5 = pneg %p701_p2 }
 0x27e   : > { %p708_p6 = por %p707_p4, %p706_p1 }
 0x280   : > { %p709_p8 = pnand %p708_p6, %p702_p5 }
 0x282   : > { %712 = shalt.err (!%p709_p8)
}
 0x283   : > { %560 = dma.vmem_to_hbm [thread:$0]  (%p885_p12), %s961_s10, 128, %s959_s28, %s407_s22  }
 0x284 PF: > { %s432_s11 = sand.u32 1, %s743_s18   ;;  %p1023_p10 = scmp.ne.s32.totalorder %s1013_s25, 0 }
 0x285   : > { %p1024_p13 = scmp.ge.s32.totalorder %s755_s21, 2  ;;  %s433_s12 = scalar_lea.sflag [#allocation4], %s432_s11 }
 0x287   : > { %p571_p3 = pnand %p1024_p13, %p1023_p10 }
 0x289   : > { %738 = dma.done.wait (!%p571_p3), %s433_s12, 128  }
 0x28a   : > { %740 = vsyncadd (!%p571_p3), %s433_s12, 4294967168  ;;  %p19_p7 = scmp.ge.s32.totalorder %s850_s30, 4   ;;  %s1025_s18 = smov %s747_s19 }
 0x28b   : > { %s1026_s19 = smov %s751_s20  ;;  %s1027_s20 = smov %s881_s8 }
 0x28c   : > { %s1028_s21 = smov %s850_s30  ;;  %21 = sbr.rel (!%p19_p7) target bundleno = 6 (0x6), region = 89 }
 0x293   :  { %438 = vsyncpa [#allocation3], 1 }
 0x294   :  { %440 = vsyncpa [#allocation3 + $0x1], 1 }
 0x295   :  { %441 = vsyncpa [#allocation6], 1 }
 0x296   :  { %442 = vsyncpa [#allocation4], 1 }
 0x297   :  { %444 = vsyncpa [#allocation4 + $0x1], 1 }

</bundles_post_ra>
